<compile_context>
chip_gen: v7x
topology: tpu7x:2x2x1
jax: 0.10.0
libtpu: 0.0.40
codegen_flags: <defaults>
</compile_context>

<pallas_src>
import functools

import jax
import jax.numpy as jnp
import numpy as np
from jax import lax
from jax.experimental import pallas as pl
from jax.experimental.pallas import tpu as pltpu

_GATE_COLS = 8   # stacked gate columns: [in_gate, out_gate, loop_gate, 5 x zero pad]
_LANE = 128
_SUBLANE = 8


def _hgcn_kernel(x_ref,            # (TB, N, Dp)  f32   full node block for this batch slab
                 mask_in_ref,      # (TN, N)      mxu   = origin_adj * adj         (row tile)
                 mask_out_ref,     # (TN, N)      mxu   = origin_adj.T * out_adj   (row tile)
                 eb_in_ref,        # (TN, Dp)     f32
                 eb_out_ref,       # (TN, Dp)     f32
                 gate_w_ref,       # (Dp, G)      mxu   stacked [in|out|loop|0..] weights
                 gate_b_ref,       # (TN, G)      f32   stacked [in|out|0..] biases
                 o_ref,            # (TB, TN, Dp) f32
                 *, tn, mxu_dtype):
    x_full = x_ref[...]
    tb, n, dp = x_full.shape

    # Cosine normalization. rsqrt -> EUP slot; eps guards all-zero rows
    # (torch would produce inf/nan there).
    inv_full = lax.rsqrt(jnp.sum(x_full * x_full, axis=-1, keepdims=True) + 1e-12)
    xn_full = (x_full * inv_full).astype(mxu_dtype)

    if tn == n:
        x_rows, xn_rows = x_full, xn_full
    else:
        row0 = pl.multiple_of(pl.program_id(1) * tn, _SUBLANE)
        x_rows = x_ref[:, pl.ds(row0, tn), :]
        inv_rows = lax.rsqrt(jnp.sum(x_rows * x_rows, axis=-1, keepdims=True) + 1e-12)
        xn_rows = (x_rows * inv_rows).astype(mxu_dtype)

    # Similarity: contract the last dims of both operands -> the MXU consumes
    # the RHS in transposed layout directly, no explicit (N, D) transpose.
    sim = jnp.abs(jnp.einsum("bnd,bmd->bnm", xn_rows, xn_full,
                             preferred_element_type=jnp.float32))
    sim = sim.astype(mxu_dtype)            # single cast of the (TB, TN, N) tensor

    # Bottom-up + top-down messages with ONE fused MXU call: stack the two
    # masked similarity blocks along the row axis so the shared RHS (x) stays
    # resident in the MXU weight path. Masks are pre-cast in the wrapper.
    a = jnp.concatenate([mask_in_ref[...] * sim,
                         mask_out_ref[...] * sim], axis=-2)          # (TB, 2TN, N)
    x_mxu = x_full.astype(mxu_dtype)
    h = jnp.einsum("bnm,bmd->bnd", a, x_mxu,
                   preferred_element_type=jnp.float32)               # (TB, 2TN, Dp)
    h_in, h_out = h[:, :tn, :], h[:, tn:, :]

    # Fused gate projection: one tall matmul, weight NOT broadcast per batch.
    gates = jnp.einsum("bnd,dg->bng", x_rows.astype(mxu_dtype), gate_w_ref[...],
                       preferred_element_type=jnp.float32)           # (TB, TN, G)
    gates = jax.nn.sigmoid(gates + gate_b_ref[...])
    g_in, g_out, g_loop = gates[..., 0:1], gates[..., 1:2], gates[..., 2:3]

    # Dropout p = 0.0 (module default) -> identity.
    # TODO(synk): training-time dropout (p > 0) is not implemented.
    msg = ((h_in + eb_in_ref[...]) * g_in
           + (h_out + eb_out_ref[...]) * g_out
           + x_rows * g_loop)
    o_ref[...] = jnp.maximum(msg, 0.0)


def _round_up(v, m):
    return (v + m - 1) // m * m


def _vmem_capacity_bytes():
    """Generation-aware physical VMEM per core; conservative fallback (v7x)."""
    try:
        cap = getattr(pltpu.get_tpu_info(), "vmem_capacity_bytes", None)
        if cap:
            return int(cap)
    except Exception:
        pass
    return 64 << 20   # v7x has 64 MiB/TC; v5e/v6e have 128 MiB


def _vmem_step_bytes(tb, tn, N, Dp, mxu_bytes):
    """Rough per-grid-step VMEM footprint (pipelined blocks + live temps)."""
    f32 = 4
    param_bufs = 1 if tn == N else 2        # Buffered(1) only when grid-invariant
    b = 2 * tb * N * Dp * f32               # x block (double-buffered, revisited over r)
    b += 2 * tb * tn * Dp * f32             # output block
    b += param_bufs * (2 * tn * N * mxu_bytes       # two adjacency masks
                       + 2 * tn * Dp * f32          # two edge biases
                       + tn * _GATE_COLS * f32)     # gate biases
    b += Dp * _GATE_COLS * mxu_bytes                # gate weights
    b += 2 * tb * N * Dp * mxu_bytes                # xn_full + x_mxu temporaries
    b += tb * tn * N * (f32 + 4 * mxu_bytes)        # f32 sim + sim/a_in/a_out/concat
    b += 4 * tb * tn * Dp * f32                     # h halves + msg temporaries
    return b


def _select_tiles(B, N, Dp, mxu_bytes, budget):
    """VMEM- and core-aware (tb, tn): biggest tiles that fit, preferring a grid
    with >= 2 steps so both v7x TensorCores get work."""
    tn_cands = [N] + [t for t in (1024, 512, 256, 128, 64, 32)
                      if t < N and N % t == 0]
    tb_cands = [t for t in range(min(B, 8), 0, -1) if B % t == 0]
    for tn in tn_cands:                       # largest row tile that fits
        fitting = [tb for tb in tb_cands
                   if _vmem_step_bytes(tb, tn, N, Dp, mxu_bytes) <= budget]
        if not fitting:
            continue
        for tb in fitting:                    # largest tb that still gives >= 2 steps
            if (B // tb) * (N // tn) >= 2:
                return tb, tn
        return fitting[0], tn
    return 1, tn_cands[-1]                    # nothing fits the budget: smallest tiles


@functools.partial(jax.jit, static_argnames=("use_bf16_mxu",))
def hierarchy_gcn_forward(x, params, use_bf16_mxu=True):
    """x: (B, N, D) float32. params: dict of HierarchyGCNModule parameters."""
    B, N, D = x.shape
    mxu_dtype = jnp.bfloat16 if use_bf16_mxu else jnp.float32
    mxu_bytes = jnp.dtype(mxu_dtype).itemsize

    # Lane-dense layout: pad the feature dim to a multiple of 128 so every
    # load/store is an unmasked full-lane access. Zero padding is exact for
    # this module (norms, matmuls, gates, relu are all unaffected).
    Dp = _round_up(D, _LANE)
    pad_d = Dp - D

    cap = _vmem_capacity_bytes()
    tb, tn = _select_tiles(B, N, Dp, mxu_bytes, int(0.70 * cap))
    est = _vmem_step_bytes(tb, tn, N, Dp, mxu_bytes)
    # Always set the scoped-VMEM limit (v5e's default is only 16 MiB).
    vmem_limit = int(min(max(1.25 * est, 32 << 20), 0.9 * cap))

    # Batch-invariant precompute (wrapper-side, once per call):
    #  * combined adjacency masks, pre-cast to the MXU dtype (no in-kernel
    #    transpose and only ONE in-kernel N^2 cast: sim)
    #  * three (D,1) gate weights stacked into a (Dp, G) matrix and the two
    #    (N,1) gate biases into one (N, G) matrix -> a single fused gate matmul
    mask_in = (params["origin_adj"] * params["adj_matrix"]).astype(mxu_dtype)
    mask_out = (params["origin_adj"].T * params["out_adj_matrix"]).astype(mxu_dtype)

    def pad_feat(a):
        return jnp.pad(a, ((0, 0),) * (a.ndim - 1) + ((0, pad_d),)) if pad_d else a

    x_p = pad_feat(x)
    eb_in = pad_feat(params["edge_bias"])
    eb_out = pad_feat(params["out_edge_bias"])
    gate_w = jnp.concatenate(
        [params["gate_weight"], params["out_gate_weight"], params["loop_gate"],
         jnp.zeros((D, _GATE_COLS - 3), jnp.float32)], axis=1)
    gate_w = jnp.pad(gate_w, ((0, pad_d), (0, 0))).astype(mxu_dtype)       # (Dp, G)
    gate_b = jnp.concatenate(
        [params["bias_gate"], params["out_bias_gate"],
         jnp.zeros((N, _GATE_COLS - 2), jnp.float32)], axis=1)             # (N, G)

    # Single-buffer parameter blocks whose index map is grid-invariant:
    # double-buffering them only doubles their VMEM footprint.
    row_invariant = (tn == N)
    row_mode = dict(pipeline_mode=pl.Buffered(1)) if row_invariant else {}

    def row_idx(b, r):
        return (r, 0)

    in_specs = [
        pl.BlockSpec((tb, N, Dp), lambda b, r: (b, 0, 0)),                 # x (node slab)
        pl.BlockSpec((tn, N), row_idx, **row_mode),                        # mask_in rows
        pl.BlockSpec((tn, N), row_idx, **row_mode),                        # mask_out rows
        pl.BlockSpec((tn, Dp), row_idx, **row_mode),                       # edge_bias rows
        pl.BlockSpec((tn, Dp), row_idx, **row_mode),                       # out_edge_bias rows
        pl.BlockSpec((Dp, _GATE_COLS), lambda b, r: (0, 0),
                     pipeline_mode=pl.Buffered(1)),                        # gate weights
        pl.BlockSpec((tn, _GATE_COLS), row_idx, **row_mode),               # gate biases
    ]
    out_specs = pl.BlockSpec((tb, tn, Dp), lambda b, r: (b, r, 0))

    cost = pl.CostEstimate(
        flops=int(2 * B * N * N * Dp            # similarity matmul
                  + 4 * B * N * N * Dp          # fused in/out message matmul
                  + 2 * B * N * Dp * _GATE_COLS # gate projection
                  + 10 * B * N * N),            # masking / abs / elementwise
        transcendentals=int(B * N * (_GATE_COLS + 1)),
        bytes_accessed=int(4 * (2 * B * N * Dp + 4 * N * Dp)
                           + 2 * mxu_bytes * N * N),
    )

    kernel = functools.partial(_hgcn_kernel, tn=tn, mxu_dtype=mxu_dtype)
    out = pl.pallas_call(
        kernel,
        out_shape=jax.ShapeDtypeStruct((B, N, Dp), jnp.float32),
        grid_spec=pltpu.PrefetchScalarGridSpec(
            num_scalar_prefetch=0,
            grid=(B // tb, N // tn),
            in_specs=in_specs,
            out_specs=out_specs,
        ),
        compiler_params=pltpu.CompilerParams(
            dimension_semantics=("parallel", "parallel"),
            vmem_limit_bytes=vmem_limit),
        cost_estimate=cost,
    )(x_p, mask_in, mask_out, eb_in, eb_out, gate_w, gate_b)
    return out[..., :D] if pad_d else out


def make_params(key, num_nodes, in_dim):
    """Deterministic synthetic parameter init mirroring reset_parameters()."""
    k_in, k_out, k_gw, k_ogw, k_lg = jax.random.split(key, 5)

    in_adj = jax.random.uniform(k_in, (num_nodes, num_nodes), jnp.float32)
    in_adj = jnp.where(in_adj > 0.5, in_adj, 0.0)
    out_adj = jax.random.uniform(k_out, (num_nodes, num_nodes), jnp.float32)
    out_adj = jnp.where(out_adj > 0.5, out_adj, 0.0)
    origin_adj = jnp.where(in_adj <= 0.0, in_adj, 1.0)

    def xavier_uniform(k, shape):
        fan_in, fan_out = shape[0], shape[1]
        bound = float(np.sqrt(6.0 / (fan_in + fan_out)))
        return jax.random.uniform(k, shape, jnp.float32, -bound, bound)

    return {
        "adj_matrix": in_adj,
        "out_adj_matrix": out_adj,
        "origin_adj": origin_adj,
        "edge_bias": jnp.zeros((num_nodes, in_dim), jnp.float32),
        "out_edge_bias": jnp.zeros((num_nodes, in_dim), jnp.float32),
        "bias_gate": jnp.zeros((num_nodes, 1), jnp.float32),
        # out_bias_gate is never initialized in reset_parameters(); use zeros.
        "out_bias_gate": jnp.zeros((num_nodes, 1), jnp.float32),
        "gate_weight": xavier_uniform(k_gw, (in_dim, 1)),
        "out_gate_weight": xavier_uniform(k_ogw, (in_dim, 1)),
        "loop_gate": xavier_uniform(k_lg, (in_dim, 1)),
    }


def _reference(x, p, use_bf16_mxu=True):
    """Pure-JAX reference of HierarchyGCNModule.forward, mirroring the kernel's
    dtype choices (set use_bf16_mxu=False here AND in the kernel for the
    module-faithful full-f32 math)."""
    mxu = jnp.bfloat16 if use_bf16_mxu else jnp.float32
    inv = jax.lax.rsqrt(jnp.sum(x * x, axis=-1, keepdims=True) + 1e-12)
    xn = (x * inv).astype(mxu)
    sim = jnp.abs(jnp.einsum("bnd,bmd->bnm", xn, xn,
                             preferred_element_type=jnp.float32)).astype(mxu)
    x_m = x.astype(mxu)
    mask_in = (p["origin_adj"] * p["adj_matrix"]).astype(mxu)
    mask_out = (p["origin_adj"].T * p["out_adj_matrix"]).astype(mxu)
    h_in = jnp.einsum("bnm,bmd->bnd", mask_in[None] * sim, x_m,
                      preferred_element_type=jnp.float32)
    h_out = jnp.einsum("bnm,bmd->bnd", mask_out[None] * sim, x_m,
                       preferred_element_type=jnp.float32)

    def gate(w, b=0.0):
        return jax.nn.sigmoid(
            jnp.einsum("bnd,de->bne", x_m, w.astype(mxu),
                       preferred_element_type=jnp.float32) + b)

    in_ = (h_in + p["edge_bias"]) * gate(p["gate_weight"], p["bias_gate"])
    out_ = (h_out + p["out_edge_bias"]) * gate(p["out_gate_weight"], p["out_bias_gate"])
    loop_ = x * gate(p["loop_gate"])
    return jax.nn.relu(in_ + out_ + loop_)


if __name__ == "__main__":
    B, N, D = 2, 8, 32  # batch, num_nodes, in_dim

    key = jax.random.PRNGKey(0)
    k_x, k_p = jax.random.split(key)
    x = jax.random.normal(k_x, (B, N, D), jnp.float32)
    params = make_params(k_p, N, D)

    y = jax.block_until_ready(hierarchy_gcn_forward(x, params))

    y_ref = _reference(x, params)
    np.testing.assert_allclose(np.asarray(y), np.asarray(y_ref),
                               rtol=2e-2, atol=2e-2)

    print("KERNEL_OK")
</pallas_src>

<mosaic_0001>
module attributes {stable_mosaic.version = 11 : i64} {
  func.func @_hgcn_kernel(%arg0: i32, %arg1: i32, %arg2: memref<1x8x128xf32, #tpu.memory_space<vmem>>, %arg3: memref<8x8xbf16, #tpu.memory_space<vmem>>, %arg4: memref<8x8xbf16, #tpu.memory_space<vmem>>, %arg5: memref<8x128xf32, #tpu.memory_space<vmem>>, %arg6: memref<8x128xf32, #tpu.memory_space<vmem>>, %arg7: memref<128x8xbf16, #tpu.memory_space<vmem>>, %arg8: memref<8x8xf32, #tpu.memory_space<vmem>>, %arg9: memref<1x8x128xf32, #tpu.memory_space<vmem>>) attributes {dimension_semantics = [#tpu.dimension_semantics<parallel>, #tpu.dimension_semantics<parallel>], iteration_bounds = array<i64: 2, 1>, scalar_prefetch = 0 : i64, scratch_operands = 0 : i64, tpu.core_type = #tpu.core_type<tc>, window_params = [{transform_indices = @transform_0, window_bounds = array<i64: 1, 8, 128>}, {pipeline_mode = #tpu.pipeline_mode<synchronous>, transform_indices = @transform_1, window_bounds = array<i64: 8, 8>}, {pipeline_mode = #tpu.pipeline_mode<synchronous>, transform_indices = @transform_2, window_bounds = array<i64: 8, 8>}, {pipeline_mode = #tpu.pipeline_mode<synchronous>, transform_indices = @transform_3, window_bounds = array<i64: 8, 128>}, {pipeline_mode = #tpu.pipeline_mode<synchronous>, transform_indices = @transform_4, window_bounds = array<i64: 8, 128>}, {pipeline_mode = #tpu.pipeline_mode<synchronous>, transform_indices = @transform_5, window_bounds = array<i64: 128, 8>}, {pipeline_mode = #tpu.pipeline_mode<synchronous>, transform_indices = @transform_6, window_bounds = array<i64: 8, 8>}, {transform_indices = @transform_7, window_bounds = array<i64: 1, 8, 128>}]} {
    %c0 = arith.constant 0 : index
    %c0_0 = arith.constant 0 : index
    %c0_1 = arith.constant 0 : index
    %0 = vector.load %arg2[%c0, %c0_0, %c0_1] : memref<1x8x128xf32, #tpu.memory_space<vmem>>, vector<1x8x128xf32>
    %1 = arith.mulf %0, %0 : vector<1x8x128xf32>
    %cst = arith.constant dense<0.000000e+00> : vector<1x8xf32>
    %2 = vector.multi_reduction <add>, %1, %cst [2] : vector<1x8x128xf32> to vector<1x8xf32>
    %3 = vector.shape_cast %2 : vector<1x8xf32> to vector<1x8x1xf32>
    %cst_2 = arith.constant 9.99999996E-13 : f32
    %4 = vector.broadcast %cst_2 : f32 to vector<1x8x1xf32>
    %5 = arith.addf %3, %4 : vector<1x8x1xf32>
    %6 = math.rsqrt %5 : vector<1x8x1xf32>
    %7 = vector.broadcast %6 : vector<1x8x1xf32> to vector<1x8x128xf32>
    %8 = arith.mulf %0, %7 : vector<1x8x128xf32>
    %9 = arith.truncf %8 : vector<1x8x128xf32> to vector<1x8x128xbf16>
    "tpu.trace_start"() <{level = 10 : i32, message = "bnd,bmd->bnm"}> : () -> ()
    %cst_3 = arith.constant dense<0.000000e+00> : vector<1x8x8xf32>
    %10 = tpu.matmul %9, %9, %cst_3 {dimension_numbers = #tpu.dot_dimension_numbers<[2], [2], [1], [1], [0, 0, 0, 1, 1, 1], [0], [0]>} : vector<1x8x128xbf16>, vector<1x8x128xbf16>, vector<1x8x8xf32> -> vector<1x8x8xf32>
    "tpu.trace_stop"() : () -> ()
    %11 = math.absf %10 : vector<1x8x8xf32>
    %12 = arith.truncf %11 : vector<1x8x8xf32> to vector<1x8x8xbf16>
    %c0_4 = arith.constant 0 : index
    %c0_5 = arith.constant 0 : index
    %13 = vector.load %arg3[%c0_4, %c0_5] : memref<8x8xbf16, #tpu.memory_space<vmem>>, vector<8x8xbf16>
    %14 = vector.shape_cast %13 : vector<8x8xbf16> to vector<1x8x8xbf16>
    %15 = arith.mulf %14, %12 : vector<1x8x8xbf16>
    %c0_6 = arith.constant 0 : index
    %c0_7 = arith.constant 0 : index
    %16 = vector.load %arg4[%c0_6, %c0_7] : memref<8x8xbf16, #tpu.memory_space<vmem>>, vector<8x8xbf16>
    %17 = vector.shape_cast %16 : vector<8x8xbf16> to vector<1x8x8xbf16>
    %18 = arith.mulf %17, %12 : vector<1x8x8xbf16>
    %19 = tpu.concatenate %15, %18 in 1 : vector<1x8x8xbf16>, vector<1x8x8xbf16> -> vector<1x16x8xbf16>
    %20 = arith.truncf %0 : vector<1x8x128xf32> to vector<1x8x128xbf16>
    "tpu.trace_start"() <{level = 10 : i32, message = "bnm,bmd->bnd"}> : () -> ()
    %cst_8 = arith.constant dense<0.000000e+00> : vector<1x16x128xf32>
    %21 = tpu.matmul %19, %20, %cst_8 {dimension_numbers = #tpu.dot_dimension_numbers<[2], [1], [1], [2], [0, 0, 0, 1, 1, 2], [0], [0]>} : vector<1x16x8xbf16>, vector<1x8x128xbf16>, vector<1x16x128xf32> -> vector<1x16x128xf32>
    "tpu.trace_stop"() : () -> ()
    %22 = vector.extract_strided_slice %21 {offsets = [0, 0, 0], sizes = [1, 8, 128], strides = [1, 1, 1]} : vector<1x16x128xf32> to vector<1x8x128xf32>
    %23 = vector.extract_strided_slice %21 {offsets = [0, 8, 0], sizes = [1, 8, 128], strides = [1, 1, 1]} : vector<1x16x128xf32> to vector<1x8x128xf32>
    %24 = arith.truncf %0 : vector<1x8x128xf32> to vector<1x8x128xbf16>
    %c0_9 = arith.constant 0 : index
    %c0_10 = arith.constant 0 : index
    %25 = vector.load %arg7[%c0_9, %c0_10] : memref<128x8xbf16, #tpu.memory_space<vmem>>, vector<128x8xbf16>
    "tpu.trace_start"() <{level = 10 : i32, message = "bnd,dg->bng"}> : () -> ()
    %cst_11 = arith.constant dense<0.000000e+00> : vector<1x8x8xf32>
    %26 = tpu.matmul %24, %25, %cst_11 {dimension_numbers = #tpu.dot_dimension_numbers<[2], [0], [0, 1], [1], [0, 0, 0, 1, 1, 1], [], []>} : vector<1x8x128xbf16>, vector<128x8xbf16>, vector<1x8x8xf32> -> vector<1x8x8xf32>
    "tpu.trace_stop"() : () -> ()
    %c0_12 = arith.constant 0 : index
    %c0_13 = arith.constant 0 : index
    %27 = vector.load %arg8[%c0_12, %c0_13] : memref<8x8xf32, #tpu.memory_space<vmem>>, vector<8x8xf32>
    %28 = vector.shape_cast %27 : vector<8x8xf32> to vector<1x8x8xf32>
    %29 = arith.addf %26, %28 : vector<1x8x8xf32>
    %30 = arith.negf %29 : vector<1x8x8xf32>
    %31 = math.exp %30 : vector<1x8x8xf32>
    %cst_14 = arith.constant 1.000000e+00 : f32
    %32 = vector.broadcast %cst_14 : f32 to vector<1x8x8xf32>
    %33 = arith.addf %32, %31 : vector<1x8x8xf32>
    %34 = arith.divf %32, %33 : vector<1x8x8xf32>
    %35 = vector.extract_strided_slice %34 {offsets = [0, 0, 0], sizes = [1, 8, 1], strides = [1, 1, 1]} : vector<1x8x8xf32> to vector<1x8x1xf32>
    %36 = vector.extract_strided_slice %34 {offsets = [0, 0, 1], sizes = [1, 8, 1], strides = [1, 1, 1]} : vector<1x8x8xf32> to vector<1x8x1xf32>
    %37 = vector.extract_strided_slice %34 {offsets = [0, 0, 2], sizes = [1, 8, 1], strides = [1, 1, 1]} : vector<1x8x8xf32> to vector<1x8x1xf32>
    %c0_15 = arith.constant 0 : index
    %c0_16 = arith.constant 0 : index
    %38 = vector.load %arg5[%c0_15, %c0_16] : memref<8x128xf32, #tpu.memory_space<vmem>>, vector<8x128xf32>
    %39 = vector.shape_cast %38 : vector<8x128xf32> to vector<1x8x128xf32>
    %40 = arith.addf %22, %39 : vector<1x8x128xf32>
    %41 = vector.broadcast %35 : vector<1x8x1xf32> to vector<1x8x128xf32>
    %42 = arith.mulf %40, %41 : vector<1x8x128xf32>
    %c0_17 = arith.constant 0 : index
    %c0_18 = arith.constant 0 : index
    %43 = vector.load %arg6[%c0_17, %c0_18] : memref<8x128xf32, #tpu.memory_space<vmem>>, vector<8x128xf32>
    %44 = vector.shape_cast %43 : vector<8x128xf32> to vector<1x8x128xf32>
    %45 = arith.addf %23, %44 : vector<1x8x128xf32>
    %46 = vector.broadcast %36 : vector<1x8x1xf32> to vector<1x8x128xf32>
    %47 = arith.mulf %45, %46 : vector<1x8x128xf32>
    %48 = arith.addf %42, %47 : vector<1x8x128xf32>
    %49 = vector.broadcast %37 : vector<1x8x1xf32> to vector<1x8x128xf32>
    %50 = arith.mulf %0, %49 : vector<1x8x128xf32>
    %51 = arith.addf %48, %50 : vector<1x8x128xf32>
    %cst_19 = arith.constant 0.000000e+00 : f32
    %52 = vector.broadcast %cst_19 : f32 to vector<1x8x128xf32>
    %53 = arith.maximumf %51, %52 : vector<1x8x128xf32>
    %c0_20 = arith.constant 0 : index
    %c0_21 = arith.constant 0 : index
    %c0_22 = arith.constant 0 : index
    %54 = vector.load %arg9[%c0_20, %c0_21, %c0_22] : memref<1x8x128xf32, #tpu.memory_space<vmem>>, vector<1x8x128xf32>
    tpu.vector_store %arg9[%c0_20, %c0_21, %c0_22], %53 {strides = array<i32>} : memref<1x8x128xf32, #tpu.memory_space<vmem>>, vector<1x8x128xf32>,
    return
  }
  func.func @transform_0(%arg0: i32, %arg1: i32) -> (i32, i32, i32) {
    %c0_i32 = arith.constant 0 : i32
    %c0_i32_0 = arith.constant 0 : i32
    %c0_i32_1 = arith.constant 0 : i32
    return %arg0, %c0_i32, %c0_i32_0 : i32, i32, i32
  }
  func.func @transform_1(%arg0: i32, %arg1: i32) -> (i32, i32) {
    %c0_i32 = arith.constant 0 : i32
    %c0_i32_0 = arith.constant 0 : i32
    return %arg1, %c0_i32 : i32, i32
  }
  func.func @transform_2(%arg0: i32, %arg1: i32) -> (i32, i32) {
    %c0_i32 = arith.constant 0 : i32
    %c0_i32_0 = arith.constant 0 : i32
    return %arg1, %c0_i32 : i32, i32
  }
  func.func @transform_3(%arg0: i32, %arg1: i32) -> (i32, i32) {
    %c0_i32 = arith.constant 0 : i32
    %c0_i32_0 = arith.constant 0 : i32
    return %arg1, %c0_i32 : i32, i32
  }
  func.func @transform_4(%arg0: i32, %arg1: i32) -> (i32, i32) {
    %c0_i32 = arith.constant 0 : i32
    %c0_i32_0 = arith.constant 0 : i32
    return %arg1, %c0_i32 : i32, i32
  }
  func.func @transform_5(%arg0: i32, %arg1: i32) -> (i32, i32) {
    %c0_i32 = arith.constant 0 : i32
    %c0_i32_0 = arith.constant 0 : i32
    %c0_i32_1 = arith.constant 0 : i32
    return %c0_i32, %c0_i32_0 : i32, i32
  }
  func.func @transform_6(%arg0: i32, %arg1: i32) -> (i32, i32) {
    %c0_i32 = arith.constant 0 : i32
    %c0_i32_0 = arith.constant 0 : i32
    return %arg1, %c0_i32 : i32, i32
  }
  func.func @transform_7(%arg0: i32, %arg1: i32) -> (i32, i32, i32) {
    %c0_i32 = arith.constant 0 : i32
    %c0_i32_0 = arith.constant 0 : i32
    return %arg0, %arg1, %c0_i32 : i32, i32, i32
  }
}

</mosaic_0001>

<bundles_post_ra>
// kernel: hierarchy_gcn_forward.1
= control target key start
LH: loop header
LB: loop body
LE: loop exit
PB: predicated region body
PF: predicated region fallthrough
CT: control target
= control target key end

     0   :  { %12 = vsyncpa [#allocation3], 0  ;;  %s1216_s0 = inlined_call_operand.vmem [shape: f32[2,8,128], index: 0, kind: input, shape index: {}]   ;;  %s1217_s1 = inlined_call_operand.vmem [shape: bf16[8,8], index: 1, kind: input, shape index: {}]   ;;  %s1218_s2 = inlined_call_operand.vmem [shape: bf16[8,8], index: 2, kind: input, shape index: {}]   ;;  %s1219_s3 = inlined_call_operand.vmem [shape: f32[8,128], index: 3, kind: input, shape index: {}]   ;;  %s1220_s4 = inlined_call_operand.vmem [shape: f32[8,128], index: 4, kind: input, shape index: {}]   ;;  %s1221_s5 = inlined_call_operand.vmem [shape: bf16[128,8], index: 5, kind: input, shape index: {}]   ;;  %s1222_s6 = inlined_call_operand.vmem [shape: f32[8,8], index: 6, kind: input, shape index: {}]   ;;  %s1223_s7 = inlined_call_operand.hbm [shape: f32[2,8,128], index: 7, kind: output, shape index: {}]  }
   0x1   :  { %14 = vsyncpa [#allocation3 + $0x1], 0  ;;  %s1052_s24 = smov 0   ;;  %s1054_s25 = smov 0  }
   0x2   :  { %s1056_s26 = smov 0   ;;  %s1058_s27 = smov 0  }
   0x3   :  { %s1060_s28 = smov 0   ;;  %s1062_s29 = smov 0  }
   0x4 LB: > { %s776_s30 = sadd.s32 4294967295, %s1004_s29   ;;  %s777_s8 = sadd.s32 4294967294, %s1004_s29   ;;  %s1004_s29 = sphi %s1062_s29, %s20_s29   ;;  %s1000_s28 = sphi %s1060_s28, %s1230_s28   ;;  %s996_s27 = sphi %s1058_s27, %s1229_s27   ;;  %s992_s26 = sphi %s1056_s26, %s1228_s26   ;;  %s988_s25 = sphi %s1054_s25, %s1227_s25   ;;  %s984_s24 = sphi %s1052_s24, %s1226_s24  }
   0x5   : > { %s32_s9 = sadd.s32 1, %s1000_s28  ;;  %s218_s10 = sadd.s32 1, %s992_s26 }
   0x6   : > { %p34_p0 = scmp.ge.s32.totalorder %s32_s9, 2  ;;  %p228_p1 = scmp.ne.s32.totalorder %s992_s26, %s988_s25 }
   0x7   : > { %p229_p2 = scmp.eq.s32.totalorder %s776_s30, 1  ;;  %p234_p3 = scmp.ne.s32.totalorder %s988_s25, %s984_s24 }
   0x8   : > { %s1232_s9 = smov (%p34_p0, %s32_s9), 0  ;;  %p235_p5 = scmp.eq.s32.totalorder %s777_s8, 1 }
   0x9   : > { %p1092_p4 = por %p229_p2, %p228_p1  ;;  %s213_s12 = ssub.s32 %s1000_s28, %s1232_s9 }
   0xa   : > { %p785_p6 = scmp.ge.s32.totalorder %s1004_s29, 1  ;;  %p216_p7 = scmp.eq.s32.totalorder %s213_s12, 0 }
   0xb   : > { %p1099_p8 = por %p235_p5, %p234_p3  ;;  %p298_p9 = scmp.lt.s32.totalorder %s1004_s29, 3 }
   0xc   : > { %s1105_s14 = scalar_select %p216_p7, %s992_s26, %s218_s10  }
   0xd   : > { %p299_p10 = pnand %p785_p6, %p298_p9 }
   0xe   : > { %p349_p11 = scmp.lt.s32.totalorder (!%p299_p10), %s996_s27, 1  ;;  %v1006_v2 = vmov (!%p299_p10), 0.0   ;;  %vm1007_vm0 = vmmov (!%p299_p10), 0   ;;  %v912_v3 = vld [vmem:[%s1221_s5] sm:$0xff] (!%p299_p10)   ;;  %v913_v4 = vld [vmem:[%s1221_s5 + $0x8] sm:$0xff] (!%p299_p10)   ;;  %v914_v5 = vld [vmem:[%s1221_s5 + $0x10] sm:$0xff] (!%p299_p10)  }
   0xf   : > { %302 = sbr.rel (%p299_p10) target bundleno = 654 (0x28e), region = 48  ;;  %816 = vmatprep.subr.bf16.mxu0 (!%p299_p10), %v1006_v2  ;;  %828 = vmatprep.subr.bf16.mxu1 (!%p299_p10), %v1006_v2  ;;  %v915_v6 = vld [vmem:[%s1221_s5 + $0x18] sm:$0xff] (!%p299_p10)   ;;  %v916_v7 = vld [vmem:[%s1221_s5 + $0x20] sm:$0xff] (!%p299_p10)   ;;  %v917_v8 = vld [vmem:[%s1221_s5 + $0x28] sm:$0xff] (!%p299_p10)   ;;  %vm431_vm1 = vcmask (!%p299_p10), 1043456   ;;  %v1008_v18 = vmov (!%p299_p10), 1  }
  0x10   : > { %818 = vmatprep.mubr.msk.bf16.mxu0 (!%p299_p10), %vm1007_vm0, %v1006_v2  ;;  %844 = vmatprep.mubr.msk.bf16.mxu1 (!%p299_p10), %vm1007_vm0, %v1006_v2  ;;  %v918_v9 = vld [vmem:[%s1221_s5 + $0x30] sm:$0xff] (!%p299_p10)   ;;  %v919_v10 = vld [vmem:[%s1221_s5 + $0x38] sm:$0xff] (!%p299_p10)   ;;  %v1009_v19 = vmov (!%p299_p10), 0   ;;  %v499_v20 = vld [vmem:[%s1222_s6] sm:$0xff] (!%p299_p10)  ;;  %v1010_v30 = vmov (!%p299_p10), 2   ;;  %vm436_vm2 = vcmask (!%p299_p10), 64512  }
  0x11   : > { %829 = vmatpush3.bf16.msra.mxu1 (!%p299_p10), %v912_v3  ;;  %909 = vset.pattern.permute.xlu1 (!%p299_p10), %v1008_v18  ;;  %v426_v34 = vld [vmem:[%s1218_s2] sm:$0xf] (!%p299_p10)  ;;  %s346_s18 = sand.u32 (!%p299_p10), 1, %s988_s25   ;;  %s800_s22 = sshll.u32 (!%p299_p10), %s996_s27, 7 }
  0x12   : > { %830 = vmatprep.subr.bf16.mxu1 (!%p299_p10), %v1006_v2  ;;  %908 = vset.pattern.permute.xlu0 (!%p299_p10), %v1009_v19  ;;  %v424_v38 = vld [vmem:[%s1217_s1] sm:$0xf] (!%p299_p10)  ;;  %s786_s21 = sshll.u32 (!%p299_p10), %s346_s18, 3  ;;  %s1169_s12 = scalar_lea.hbm (!%p299_p10), %s1223_s7, %s800_s22 }
  0x13   : > { %v594_v44 = vld [vmem:[%s1219_s3] sm:$0xff] (!%p299_p10)  ;;  %s348_s23 = scalar_lea.vmem (!%p299_p10), [#allocation2], %s786_s21 }
  0x14   : > { %v602_v46 = vld [vmem:[%s1220_s4] sm:$0xff] (!%p299_p10)  ;;  %s633_s30 = sshll.u32 (!%p299_p10), %s348_s23, 4  ;;  %s1171_s30 = int_to_ptr.vmem [resolvable:$true] %s633_s30 }
  0x15   : > { %831 = vmatpush3.bf16.msra.mxu1 (!%p299_p10), %v913_v4 }
  0x16   : > { %s350_s15 = scalar_select %p349_p11, %s996_s27, 1  ;;  %832 = vmatprep.subr.bf16.mxu1 %v1006_v2 }
  0x17   : > { %s1011_s27 = smov [#allocation2]  }
  0x18   : > { %s787_s16 = sshll.u32 %s350_s15, 3  ;;  %s619_s15 = scalar_lea.sflag [#allocation3], %s346_s18 }
  0x19   : > { %s352_s19 = scalar_lea.vmem %s1216_s0, %s787_s16  ;;  %833 = vmatpush3.bf16.msra.mxu1 %v914_v5  ;;  %s926_s16 = scalar_lea.vmem %s1171_s30, 128 }
  0x1a   : > { %v1112_v0 = vld [vmem:[%s352_s19] sm:$0xff]  ;;  %834 = vmatprep.subr.bf16.mxu1 %v1006_v2  ;;  %p927_p12 = scmp.ne.s32.totalorder %s1171_s30, %s926_s16  ;;  %s930_s17 = sshll.u32 %s1011_s27, 4  ;;  %s931_s17 = int_to_ptr.vmem [resolvable:$false] %s930_s17 }
  0x1b   : > { %v375_v1 = vmul.f32 %v1112_v0, %v1112_v0  ;;  %v435_v11 = vpack.c.bf16 %v1112_v0, %v1112_v0  ;;  %s932_s19 = scalar_lea.vmem %s931_s17, 256  ;;  %p933_p1 = scmp.lt.s32.totalorder %s1171_s30, %s931_s17 }
  0x1c   : > { %p928_p13 = pnand %p927_p12, %p1092_p4  ;;  %p934_p2 = scmp.lt.s32.totalorder %s932_s19, %s926_s16 }
  0x1d   : > { %376 = vadd.xlane.f32.xlu0 %v375_v1  ;;  %835 = vmatpush3.bf16.msra.mxu1 %v915_v6  ;;  %v440_v17 = vsel %vm431_vm1, %v435_v11, 0 }
  0x1e   : > { %836 = vmatprep.subr.bf16.mxu1 %v1006_v2  ;;  %p929_p0 = pneg %p928_p13  ;;  %p935_p3 = por %p934_p2, %p933_p1 }
  0x20   : > { %p936_p5 = pnand %p935_p3, %p929_p0 }
  0x21   : > { %837 = vmatpush3.bf16.msra.mxu1 %v916_v7 }
  0x22   : > { %838 = vmatprep.subr.bf16.mxu1 %v1006_v2 }
  0x25   : > { %839 = vmatpush3.bf16.msra.mxu1 %v917_v8 }
  0x26   : > { %840 = vmatprep.subr.bf16.mxu1 %v1006_v2 }
  0x29   : > { %841 = vmatpush3.bf16.msra.mxu1 %v918_v9 }
  0x2a   : > { %842 = vmatprep.subr.bf16.mxu1 %v1006_v2 }
  0x2d   : > { %843 = vmatpush3.bf16.msra.mxu1 %v919_v10 }
  0x30   : > { %845 = vmatmul.mubr.bf16.vlgmr.msra.gmra.mrb[0].mxu1 %v435_v11 }
  0xaa   : > { %v377_v12 = vpop.xlane.xlu0 %376 }
  0xab   : > { %v378_v13 = vadd.f32 1e-12, %v377_v12 }
  0xad   : > { %920 = vrsqrt.f32 %v378_v13 }
  0xb7   : > { %v921_v14 = vpop.eup %920 }
  0xb8   : > { %v380_v15 = vmul.f32 %v921_v14, %v1112_v0 }
  0xba   : > { %v381_v16 = vpack.c.bf16 %v380_v15, %v380_v15 }
  0xbc   : > { %817 = vmatpush3.bf16.xpose.msra.mxu0 %v381_v16 }
  0xbd   : > { %822 = vmatprep.subr.bf16.mxu0 %v1006_v2 }
  0xc3   : > { %819 = vmatmul.mubr.bf16.vlgmr.msra.gmra.mrb[0].mxu0 %v381_v16 }
  0xc4   : > { %824 = vmatprep.mubr.msk.bf16.mxu0 %vm1007_vm0, %v1006_v2  ;;  %823 = vmatpush3.bf16.msra.mxu0 %v440_v17 }
 0x103   : > { %v582_v21 = vpop.f32.mrb[0].mxu1 }
 0x104   : > { %v583_v22 = vadd.f32 %v582_v21, %v499_v20  ;;  %v846_v23 = vpop.f32.mrb[1].mxu1 }
 0x105   : > { %v585_v24 = vpop.f32.mrb[2].mxu1 }
 0x106   : > { %v798_v25 = vmul.f32 -1.442695, %v583_v22  ;;  %v847_v26 = vpop.f32.mrb[3].mxu1 }
 0x108   : > { %922 = vpow2.f32 %v798_v25 }
 0x112   : > { %v923_v27 = vpop.eup %922 }
 0x113   : > { %v591_v28 = vadd.f32 1.0, %v923_v27 }
 0x115   : > { %924 = vrcp.f32 %v591_v28 }
 0x11f   : > { %v925_v29 = vpop.eup %924 }
 0x120   : > { %605 = vperm.xlu1 %909, %v925_v29   ;;  %598 = vperm.xlu0 %908, %v925_v29  }
 0x124   : > { %910 = vset.pattern.permute.xlu1 %v1010_v30  ;;  %911 = vset.pattern.permute.xlu0 %v1010_v30 }
 0x125   : > { %611 = vperm.xlu1 %910, %v925_v29  }
 0x196   : > { %v416_v31 = vpop.f32.mrb[0].mxu0 }
 0x197   : > { %v422_v32 = vand.u32 2147483647, %v416_v31  ;;  %v820_v33 = vpop.f32.mrb[1].mxu0 }
 0x198   : > { %v419_v35 = vpop.f32.mrb[2].mxu0 }
 0x199   : > { %v423_v36 = vpack.c.bf16 %v422_v32, %v422_v32  ;;  %v821_v37 = vpop.f32.mrb[3].mxu0 }
 0x19b   : > { %v427_v39 = vmul.bf16 %v426_v34, %v423_v36  ;;  %v425_v40 = vmul.bf16 %v424_v38, %v423_v36 }
 0x19d   : > { %v788_v41 = vcombine.low %v427_v39, %v427_v39 }
 0x19f   : > { %v434_v42 = vsel %vm431_vm1, %v425_v40, %v788_v41  ;;  %v606_v43 = vpop.permute.xlu1 %605  ;;  %v599_v49 = vpop.permute.xlu0 %598 }
 0x1a0   : > { %825 = vmatmul.mubr.msk.bf16.vlgmr.msra.gmra.mrb[4].mxu0 %vm436_vm2, %v434_v42 }
 0x1a4   : > { %v612_v53 = vpop.permute.xlu1 %611 }
 0x1a5   : > { %v614_v56 = vmul.f32 %v612_v53, %v1112_v0 }
 0x273   : > { %v476_v45 = vpop.f32.mrb[4].mxu0 }
 0x274   : > { %v595_v47 = vadd.f32 %v594_v44, %v476_v45  ;;  %v826_v48 = vpop.f32.mrb[5].mxu0 }
 0x275   : > { %v479_v50 = vpop.f32.mrb[6].mxu0 }
 0x276   : > { %v603_v51 = vadd.f32 %v602_v46, %v479_v50  ;;  %v827_v52 = vpop.f32.mrb[7].mxu0  ;;  %v601_v54 = vmul.f32 %v599_v49, %v595_v47 }
 0x278   : > { %v608_v55 = vmul.f32 %v606_v43, %v603_v51 }
 0x27a   : > { %v609_v57 = vadd.f32 %v608_v55, %v601_v54 }
 0x27c   : > { %v615_v58 = vadd.f32 %v614_v56, %v609_v57 }
 0x27e   : > { %v616_v59 = vmax.f32 %v615_v58, 0.0 }
 0x280   : > { %617 = vst [vmem:[%s348_s23] sm:$0xff] %v616_v59 }
 0x281   : > { %939 = shalt.err (!%p936_p5)
}
 0x282   : > { %s940_s18 = scalar_lea.hbm %s1169_s12, 128  ;;  %s944_s22 = scalar_lea.hbm %s1223_s7, 256 }
 0x283   : > { %p941_p6 = scmp.ne.s32.totalorder %s1169_s12, %s940_s18  ;;  %p945_p10 = scmp.lt.u32.totalorder %s1169_s12, %s1223_s7 }
 0x284   : > { %p946_p11 = scmp.lt.u32.totalorder %s944_s22, %s940_s18  ;;  %p948_p13 = scmp.lt.u32.totalorder %s940_s18, %s1169_s12 }
 0x285   : > { %p942_p7 = pnand %p941_p6, %p1092_p4 }
 0x286   : > { %p947_p12 = por %p946_p11, %p945_p10 }
 0x287   : > { %p943_p9 = pneg %p942_p7 }
 0x288   : > { %p949_p0 = por %p948_p13, %p947_p12 }
 0x28a   : > { %p950_p1 = pnand %p949_p0, %p943_p9 }
 0x28c   : > { %953 = shalt.err (!%p950_p1)
}
 0x28d   : > { %848 = dma.vmem_to_hbm [thread:$0]  (%p1092_p4), %s1171_s30, 128, %s1169_s12, %s619_s15  }
 0x28e PF: > { %p854_p2 = scmp.ge.s32.totalorder %s1004_s29, 2  ;;  %s645_s10 = sand.u32 1, %s984_s24  }
 0x28f   : > { %s646_s16 = scalar_lea.sflag [#allocation3], %s645_s10 }
 0x290   : > { %p851_p3 = pnand %p854_p2, %p1099_p8 }
 0x292   : > { %979 = dma.done.wait (!%p851_p3), %s646_s16, 128  }
 0x293   : > { %981 = vsyncadd (!%p851_p3), %s646_s16, 4294967168  ;;  %s20_s29 = sadd.s32 1, %s1004_s29   ;;  %s1226_s24 = smov %s988_s25 }
 0x294   : > { %p17_p5 = scmp.ge.s32.totalorder %s20_s29, 4   ;;  %s1227_s25 = smov %s992_s26 }
 0x295   : > { %s1228_s26 = smov %s1105_s14  ;;  %s1229_s27 = smov %s1000_s28 }
 0x296   : > { %s1230_s28 = smov %s1232_s9  ;;  %19 = sbr.rel (!%p17_p5) target bundleno = 4 (0x4), region = 98 }
 0x29d   :  { %651 = vsyncpa [#allocation3], 1 }
 0x29e   :  { %653 = vsyncpa [#allocation3 + $0x1], 1 }

</bundles_post_ra>
